<compile_context>
chip_gen: v7x
topology: tpu7x:2x2x1
jax: 0.10.0
libtpu: 0.0.40
codegen_flags: <defaults>
</compile_context>

<pallas_src>
import math
import functools

import jax
import jax.numpy as jnp
from jax.experimental import pallas as pl
from jax.experimental.pallas import tpu as pltpu


def _round_up(v, mult):
    return ((v + mult - 1) // mult) * mult


def _margin_cosine_kernel(label_ref, x_ref, xnorm_ref, w_ref, wnorm_ref, o_ref,
                          *, s, m, eps, c_tile):
    # label : (B, 1) int32   resident
    # x     : (B, D)         resident
    # xnorm : (B, 1) f32     resident
    # w     : (TC, D)        streamed class tile
    # wnorm : (1, TC) f32    streamed class tile
    # o     : (B, TC) f32
    j = pl.program_id(0)

    # Inner products: contract over the last (lane) axis of BOTH operands so the
    # MXU consumes w in its natural (C, D) layout -- no explicit transpose.
    ip = jax.lax.dot_general(
        x_ref[...], w_ref[...],
        dimension_numbers=(((1,), (1,)), ((), ())),
        preferred_element_type=jnp.float32)                        # (B, TC)

    # torch.ger(||x||, ||w||).clamp(min=eps); norms are precomputed outside.
    denom = jnp.maximum(xnorm_ref[...] * wnorm_ref[...], eps)      # (B, TC)

    # EUP approximate reciprocal + one Newton-Raphson refinement (~f32 accurate).
    inv = pl.reciprocal(denom, approx=True)
    inv = inv * (2.0 - denom * inv)
    cosine = ip * inv

    # Fused one-hot margin: subtract m only on the label column of this tile.
    col = jax.lax.broadcasted_iota(jnp.int32, cosine.shape, 1) + j * c_tile
    out = jnp.where(col == label_ref[...], cosine - m, cosine)

    o_ref[...] = (s * out).astype(o_ref.dtype)


def margin_cosine_product(x, weight, label, *, s=30.0, m=0.4, eps=1e-8,
                          compute_dtype=None):
    """CosFace forward. x: (B, D), weight: (C, D), label: (B,) int -> (B, C) f32."""
    B, D = x.shape
    C, D2 = weight.shape
    assert D == D2, "feature dims must match"

    # Default f32 matmul feed for exact parity with the PyTorch module; pass
    # compute_dtype=jnp.bfloat16 to halve weight-stream bytes on v6e/v7x.
    cdt = jnp.dtype(compute_dtype) if compute_dtype is not None else jnp.dtype(jnp.float32)
    itemsize = cdt.itemsize

    # Exact L2 norms, precomputed once per call (weight norms depend only on W).
    x32 = x.astype(jnp.float32)
    w32 = weight.astype(jnp.float32)
    x_norm = jnp.sqrt(jnp.sum(x32 * x32, axis=1, keepdims=True))                # (B, 1)
    w_norm = jnp.sqrt(jnp.sum(w32 * w32, axis=1, keepdims=True)).reshape(1, C)  # (1, C)

    # Pad B to a sublane multiple; choose a 128-multiple class tile sized so the
    # double-buffered (weight + output + wnorm) tiles fit a conservative VMEM
    # budget (safe on v7x's 64 MiB parts); pad C to a multiple of that tile so
    # all output stores are lane-dense.
    B_pad = _round_up(max(B, 1), 8)
    per_col = 2 * (D * itemsize + B_pad * 4 + 8 * 4)    # dbl-buffered bytes / class column
    budget = 24 << 20
    TC = max(128, (budget // per_col) // 128 * 128)
    TC = int(min(TC, _round_up(C, 128)))
    C_pad = _round_up(C, TC)

    x_p = jnp.zeros((B_pad, D), cdt).at[:B].set(x.astype(cdt))
    w_p = jnp.zeros((C_pad, D), cdt).at[:C].set(weight.astype(cdt))
    xn_p = jnp.zeros((B_pad, 1), jnp.float32).at[:B].set(x_norm)
    wn_p = jnp.zeros((1, C_pad), jnp.float32).at[:, :C].set(w_norm)
    lbl_p = jnp.full((B_pad, 1), -1, jnp.int32).at[:B, 0].set(label.astype(jnp.int32))

    grid = (C_pad // TC,)

    est_vmem = TC * per_col + 2 * (B_pad * D * itemsize + 2 * B_pad * 128 * 4)
    vmem_limit = int(min(60 << 20, max(32 << 20, est_vmem + (4 << 20))))

    kernel = functools.partial(_margin_cosine_kernel,
                               s=float(s), m=float(m), eps=float(eps), c_tile=TC)

    out = pl.pallas_call(
        kernel,
        out_shape=jax.ShapeDtypeStruct((B_pad, C_pad), jnp.float32),
        grid=grid,
        in_specs=[
            pl.BlockSpec((B_pad, 1), lambda j: (0, 0)),   # label  (resident)
            pl.BlockSpec((B_pad, D), lambda j: (0, 0)),   # x      (resident)
            pl.BlockSpec((B_pad, 1), lambda j: (0, 0)),   # ||x||  (resident)
            pl.BlockSpec((TC, D),   lambda j: (j, 0)),    # weight (streamed over C)
            pl.BlockSpec((1, TC),   lambda j: (0, j)),    # ||w||  (streamed over C)
        ],
        out_specs=pl.BlockSpec((B_pad, TC), lambda j: (0, j)),
        compiler_params=pltpu.CompilerParams(
            dimension_semantics=("parallel",),
            vmem_limit_bytes=vmem_limit),
    )(lbl_p, x_p, xn_p, w_p, wn_p)

    return out[:B, :C]


if __name__ == "__main__":
    # Small shapes consistent with the module: batch=6, in_features=32, out_features=16
    # (deliberately non-aligned to exercise the padding / lane-dense tiling path).
    B, D, C = 6, 32, 16
    s, m = 30.0, 0.4

    key = jax.random.PRNGKey(0)
    kx, kw, kl = jax.random.split(key, 3)

    # deterministic xavier_uniform_-style init for weight (out_features, in_features)
    bound = math.sqrt(6.0 / (D + C))
    weight = jax.random.uniform(kw, (C, D), jnp.float32, -bound, bound)
    x = jax.random.normal(kx, (B, D), dtype=jnp.float32)
    label = jax.random.randint(kl, (B,), 0, C, dtype=jnp.int32)

    out = jax.block_until_ready(margin_cosine_product(x, weight, label, s=s, m=m))

    # plain-JAX reference check
    ip = x @ weight.T
    w1 = jnp.linalg.norm(x, axis=1)
    w2 = jnp.linalg.norm(weight, axis=1)
    cosine = ip / jnp.maximum(jnp.outer(w1, w2), 1e-8)
    one_hot = jax.nn.one_hot(label, C, dtype=jnp.float32)
    ref = s * (cosine - one_hot * m)
    assert out.shape == (B, C)
    assert jnp.allclose(out, ref, atol=1e-4, rtol=1e-4), "mismatch vs reference"

    print("KERNEL_OK")
</pallas_src>

<mosaic_0001>
module attributes {stable_mosaic.version = 11 : i64} {
  func.func @_margin_cosine_kernel(%arg0: i32, %arg1: memref<8x1xi32, #tpu.memory_space<vmem>>, %arg2: memref<8x32xf32, #tpu.memory_space<vmem>>, %arg3: memref<8x1xf32, #tpu.memory_space<vmem>>, %arg4: memref<128x32xf32, #tpu.memory_space<vmem>>, %arg5: memref<1x128xf32, #tpu.memory_space<vmem>>, %arg6: memref<8x128xf32, #tpu.memory_space<vmem>>) attributes {dimension_semantics = [#tpu.dimension_semantics<parallel>], iteration_bounds = array<i64: 1>, scalar_prefetch = 0 : i64, scratch_operands = 0 : i64, tpu.core_type = #tpu.core_type<tc>, window_params = [{pipeline_mode = #tpu.pipeline_mode<synchronous>, transform_indices = @transform_0, window_bounds = array<i64: 8, 1>}, {pipeline_mode = #tpu.pipeline_mode<synchronous>, transform_indices = @transform_1, window_bounds = array<i64: 8, 32>}, {pipeline_mode = #tpu.pipeline_mode<synchronous>, transform_indices = @transform_2, window_bounds = array<i64: 8, 1>}, {transform_indices = @transform_3, window_bounds = array<i64: 128, 32>}, {transform_indices = @transform_4, window_bounds = array<i64: 1, 128>}, {transform_indices = @transform_5, window_bounds = array<i64: 8, 128>}]} {
    %c0 = arith.constant 0 : index
    %c0_0 = arith.constant 0 : index
    %0 = vector.load %arg2[%c0, %c0_0] : memref<8x32xf32, #tpu.memory_space<vmem>>, vector<8x32xf32>
    %c0_1 = arith.constant 0 : index
    %c0_2 = arith.constant 0 : index
    %1 = vector.load %arg4[%c0_1, %c0_2] : memref<128x32xf32, #tpu.memory_space<vmem>>, vector<128x32xf32>
    %cst = arith.constant dense<0.000000e+00> : vector<8x128xf32>
    %2 = tpu.matmul %0, %1, %cst {dimension_numbers = #tpu.dot_dimension_numbers<[1], [1], [0], [0], [0, 0, 1, 0], [], []>} : vector<8x32xf32>, vector<128x32xf32>, vector<8x128xf32> -> vector<8x128xf32>
    %c0_3 = arith.constant 0 : index
    %c0_4 = arith.constant 0 : index
    %3 = vector.load %arg3[%c0_3, %c0_4] : memref<8x1xf32, #tpu.memory_space<vmem>>, vector<8x1xf32>
    %c0_5 = arith.constant 0 : index
    %c0_6 = arith.constant 0 : index
    %4 = vector.load %arg5[%c0_5, %c0_6] : memref<1x128xf32, #tpu.memory_space<vmem>>, vector<1x128xf32>
    %5 = vector.broadcast %3 : vector<8x1xf32> to vector<8x128xf32>
    %6 = vector.broadcast %4 : vector<1x128xf32> to vector<8x128xf32>
    %7 = arith.mulf %5, %6 : vector<8x128xf32>
    %cst_7 = arith.constant 9.99999993E-9 : f32
    %8 = vector.broadcast %cst_7 : f32 to vector<8x128xf32>
    %9 = arith.maximumf %7, %8 : vector<8x128xf32>
    %10 = tpu.reciprocal %9 {approx = true} : vector<8x128xf32> -> vector<8x128xf32>
    %11 = arith.mulf %9, %10 : vector<8x128xf32>
    %cst_8 = arith.constant 2.000000e+00 : f32
    %12 = vector.broadcast %cst_8 : f32 to vector<8x128xf32>
    %13 = arith.subf %12, %11 : vector<8x128xf32>
    %14 = arith.mulf %10, %13 : vector<8x128xf32>
    %15 = arith.mulf %2, %14 : vector<8x128xf32>
    %16 = tpu.iota {dimensions = array<i32: 1>} : vector<8x128xi32>
    %c128_i32 = arith.constant 128 : i32
    %17 = arith.muli %arg0, %c128_i32 : i32
    %18 = vector.broadcast %17 : i32 to vector<8x128xi32>
    %19 = arith.addi %16, %18 : vector<8x128xi32>
    %c0_9 = arith.constant 0 : index
    %c0_10 = arith.constant 0 : index
    %20 = vector.load %arg1[%c0_9, %c0_10] : memref<8x1xi32, #tpu.memory_space<vmem>>, vector<8x1xi32>
    %21 = vector.broadcast %20 : vector<8x1xi32> to vector<8x128xi32>
    %22 = arith.cmpi eq, %19, %21 : vector<8x128xi32>
    %cst_11 = arith.constant 4.000000e-01 : f32
    %23 = vector.broadcast %cst_11 : f32 to vector<8x128xf32>
    %24 = arith.subf %15, %23 : vector<8x128xf32>
    %25 = arith.select %22, %24, %15 : vector<8x128xi1>, vector<8x128xf32>
    %cst_12 = arith.constant 3.000000e+01 : f32
    %26 = vector.broadcast %cst_12 : f32 to vector<8x128xf32>
    %27 = arith.mulf %26, %25 : vector<8x128xf32>
    %c0_13 = arith.constant 0 : index
    %c0_14 = arith.constant 0 : index
    %28 = vector.load %arg6[%c0_13, %c0_14] : memref<8x128xf32, #tpu.memory_space<vmem>>, vector<8x128xf32>
    tpu.vector_store %arg6[%c0_13, %c0_14], %27 {strides = array<i32>} : memref<8x128xf32, #tpu.memory_space<vmem>>, vector<8x128xf32>,
    return
  }
  func.func @transform_0(%arg0: i32) -> (i32, i32) {
    %c0_i32 = arith.constant 0 : i32
    %c0_i32_0 = arith.constant 0 : i32
    %c0_i32_1 = arith.constant 0 : i32
    return %c0_i32, %c0_i32_0 : i32, i32
  }
  func.func @transform_1(%arg0: i32) -> (i32, i32) {
    %c0_i32 = arith.constant 0 : i32
    %c0_i32_0 = arith.constant 0 : i32
    %c0_i32_1 = arith.constant 0 : i32
    return %c0_i32, %c0_i32_0 : i32, i32
  }
  func.func @transform_2(%arg0: i32) -> (i32, i32) {
    %c0_i32 = arith.constant 0 : i32
    %c0_i32_0 = arith.constant 0 : i32
    %c0_i32_1 = arith.constant 0 : i32
    return %c0_i32, %c0_i32_0 : i32, i32
  }
  func.func @transform_3(%arg0: i32) -> (i32, i32) {
    %c0_i32 = arith.constant 0 : i32
    %c0_i32_0 = arith.constant 0 : i32
    return %arg0, %c0_i32 : i32, i32
  }
  func.func @transform_4(%arg0: i32) -> (i32, i32) {
    %c0_i32 = arith.constant 0 : i32
    %c0_i32_0 = arith.constant 0 : i32
    return %c0_i32, %arg0 : i32, i32
  }
  func.func @transform_5(%arg0: i32) -> (i32, i32) {
    %c0_i32 = arith.constant 0 : i32
    %c0_i32_0 = arith.constant 0 : i32
    return %c0_i32, %arg0 : i32, i32
  }
}

</mosaic_0001>

<bundles_post_ra>
// kernel: tpu_custom_call.1
= control target key start
LH: loop header
LB: loop body
LE: loop exit
PB: predicated region body
PF: predicated region fallthrough
CT: control target
= control target key end

     0   :  { %vm38_vm0 = vcmask 261120   ;;  %v343_v2 = vmov 0.0|0.0   ;;  %vm344_vm2 = vmmov 0   ;;  %v345_v5 = vmov 0.0   ;;  %s473_s0 = inlined_call_operand.vmem [shape: s32[8,1], index: 0, kind: input, shape index: {}]   ;;  %s474_s1 = inlined_call_operand.vmem [shape: f32[8,32], index: 1, kind: input, shape index: {}]   ;;  %s475_s2 = inlined_call_operand.vmem [shape: f32[8,1], index: 2, kind: input, shape index: {}]   ;;  %s476_s3 = inlined_call_operand.vmem [shape: f32[128,32], index: 3, kind: input, shape index: {}]   ;;  %s477_s4 = inlined_call_operand.vmem [shape: f32[1,128], index: 4, kind: input, shape index: {}]   ;;  %s478_s5 = inlined_call_operand.hbm [shape: f32[8,128], index: 5, kind: output, shape index: {}]  }
   0x1   :  { %v22_v0 = vld [vmem:[%s476_s3] sm:$0xff]  ;;  %v23_v1 = vld [vmem:[%s476_s3 + $0x8] sm:$0xff]  ;;  %279 = vmatprep.subr.bf16.mxu0 %v343_v2  ;;  %vm386_vm1 = vmpackc.low %vm38_vm0, %vm38_vm0  ;;  %276 = vmatprep.mubr.msk.f32.mxu0 %vm344_vm2, %v345_v5  ;;  %v346_v6 = vmov 0  }
   0x2   :  { %v280_v3 = vpack.c.bf16 %v23_v1, %v22_v0  ;;  %316 = vset.pattern.permute.xlu0 %v346_v6  ;;  %v24_v7 = vld [vmem:[%s476_s3 + $0x10] sm:$0xff]  ;;  %v25_v8 = vld [vmem:[%s476_s3 + $0x18] sm:$0xff]  ;;  %v160_v9 = vld [vmem:[%s475_s2] sm:$0xff] }
   0x3   :  { %v284_v10 = vpack.c.bf16 %v25_v8, %v24_v7  ;;  %164 = vperm.xlu0 %316, %v160_v9  }
   0x4   :  { %282 = vmatpush3.bf16.xpose.msk.msra.mxu0 %vm386_vm1, %v280_v3 }
   0x5   :  { %283 = vmatprep.subr.bf16.mxu0 %v343_v2 }
   0x6   :  { %10 = vsyncpa [#allocation3], 0  ;;  %v185_v11 = vld [vmem:[%s473_s0] sm:$0xff]  ;;  %v27_v13 = vld [vmem:[%s476_s3 + $0x28] sm:$0xff]  ;;  %v180_v38 = vlaneseq }
   0x7   :  { %187 = vperm.xlu0 %316, %v185_v11   ;;  %v26_v12 = vld [vmem:[%s476_s3 + $0x20] sm:$0xff]  ;;  %v28_v15 = vld [vmem:[%s476_s3 + $0x30] sm:$0xff]  ;;  %v29_v16 = vld [vmem:[%s476_s3 + $0x38] sm:$0xff] }
   0x8   :  { %v288_v14 = vpack.c.bf16 %v27_v13, %v26_v12  ;;  %v292_v17 = vpack.c.bf16 %v29_v16, %v28_v15  ;;  %v30_v18 = vld [vmem:[%s476_s3 + $0x40] sm:$0xff]  ;;  %v31_v19 = vld [vmem:[%s476_s3 + $0x48] sm:$0xff]  ;;  %v32_v21 = vld [vmem:[%s476_s3 + $0x50] sm:$0xff]  ;;  %v181_v40 = vand.u32 127, %v180_v38 }
   0x9   :  { %v296_v20 = vpack.c.bf16 %v31_v19, %v30_v18  ;;  %v33_v22 = vld [vmem:[%s476_s3 + $0x58] sm:$0xff]  ;;  %v34_v24 = vld [vmem:[%s476_s3 + $0x60] sm:$0xff]  ;;  %v35_v25 = vld [vmem:[%s476_s3 + $0x68] sm:$0xff] }
   0xa   :  { %v300_v23 = vpack.c.bf16 %v33_v22, %v32_v21  ;;  %v304_v26 = vpack.c.bf16 %v35_v25, %v34_v24  ;;  %v36_v27 = vld [vmem:[%s476_s3 + $0x70] sm:$0xff]  ;;  %v37_v28 = vld [vmem:[%s476_s3 + $0x78] sm:$0xff]  ;;  %v21_v30 = vld [vmem:[%s474_s1] sm:$0xff]  ;;  %s347_s1 = smov [#allocation2]  }
   0xb   :  { %v308_v29 = vpack.c.bf16 %v37_v28, %v36_v27  ;;  %v225_v31 = vld [vmem:[%s477_s4] ss:$0 sm:$0xff]  ;;  %s200_s3 = sshll.u32 %s347_s1, 4  ;;  %s201_s3 = int_to_ptr.vmem [resolvable:$true] %s200_s3 }
   0xc   :  { %286 = vmatpush3.bf16.xpose.msk.msra.mxu0 %vm386_vm1, %v284_v10  ;;  %s319_s4 = scalar_lea.vmem %s201_s3, 128  ;;  %p324_p1 = scmp.lt.s32.totalorder %s201_s3, %s201_s3 }
   0xd   :  { %287 = vmatprep.subr.bf16.mxu0 %v343_v2  ;;  %p320_p0 = scmp.ne.s32.totalorder %s201_s3, %s319_s4  ;;  %p325_p2 = scmp.lt.s32.totalorder %s319_s4, %s319_s4 }
   0xf   :  { %p326_p3 = por %p325_p2, %p324_p1 }
  0x11   :  { %p327_p4 = pnand %p326_p3, %p320_p0 }
  0x14   :  { %290 = vmatpush3.bf16.xpose.msk.msra.mxu0 %vm386_vm1, %v288_v14 }
  0x15   :  { %291 = vmatprep.subr.bf16.mxu0 %v343_v2 }
  0x1c   :  { %294 = vmatpush3.bf16.xpose.msk.msra.mxu0 %vm386_vm1, %v292_v17 }
  0x1d   :  { %295 = vmatprep.subr.bf16.mxu0 %v343_v2 }
  0x24   :  { %298 = vmatpush3.bf16.xpose.msk.msra.mxu0 %vm386_vm1, %v296_v20 }
  0x25   :  { %299 = vmatprep.subr.bf16.mxu0 %v343_v2 }
  0x2c   :  { %302 = vmatpush3.bf16.xpose.msk.msra.mxu0 %vm386_vm1, %v300_v23 }
  0x2d   :  { %303 = vmatprep.subr.bf16.mxu0 %v343_v2 }
  0x34   :  { %306 = vmatpush3.bf16.xpose.msk.msra.mxu0 %vm386_vm1, %v304_v26 }
  0x35   :  { %307 = vmatprep.subr.bf16.mxu0 %v343_v2 }
  0x3c   :  { %310 = vmatpush3.bf16.xpose.msk.msra.mxu0 %vm386_vm1, %v308_v29 }
  0x43   :  { %277 = vmatmul.mubr.msk.f32.vlgmr.msra.gmra.mrb[0].mxu0 %vm38_vm0, %v21_v30 }
  0x82   :  { %v165_v32 = vpop.permute.xlu0 %164 }
  0x83   :  { %v173_v33 = vmul.f32 %v225_v31, %v165_v32 }
  0x85   :  { %v174_v34 = vmax.f32 %v173_v33, 1e-08 }
  0x86   :  { %v188_v42 = vpop.permute.xlu0 %187 }
  0x87   :  { %317 = vrcp.f32 %v174_v34  ;;  %vm189_vm3 = vcmp.eq.s32.totalorder %v181_v40, %v188_v42 }
  0x91   :  { %v318_v35 = vpop.eup %317 }
  0x92   :  { %v176_v36 = vmul.f32 %v318_v35, %v174_v34 }
  0x94   :  { %v177_v37 = vsub.f32 2.0, %v176_v36 }
  0x96   :  { %v178_v39 = vmul.f32 %v318_v35, %v177_v37 }
 0x116   :  { %v156_v41 = vpop.f32.mrb[0].mxu0 }
 0x117   :  { %v179_v43 = vmul.f32 %v178_v39, %v156_v41  ;;  %v278_v44 = vpop.f32.mrb[1].mxu0 }
 0x119   :  { %v226_v45 = vadd.f32 -0.4, %v179_v43 }
 0x11b   :  { %v191_v46 = vsel %vm189_vm3, %v226_v45, %v179_v43 }
 0x11c   :  { %v192_v47 = vmul.f32 30.0, %v191_v46 }
 0x11e   :  { %193 = vst [vmem:[#allocation2] sm:$0xff] %v192_v47 }
 0x11f   :  { %330 = shalt.err (!%p327_p4)
}
 0x120   :  { %s331_s8 = scalar_lea.hbm %s478_s5, 128 }
 0x121   :  { %p332_p5 = scmp.ne.s32.totalorder %s478_s5, %s331_s8  ;;  %p335_p6 = scmp.lt.u32.totalorder %s331_s8, %s478_s5 }
 0x123   :  { %p337_p7 = pnand %p335_p6, %p332_p5 }
 0x125   :  { %340 = shalt.err (!%p337_p7)
}
 0x126   :  { %203 = dma.vmem_to_hbm [thread:$0]  %s201_s3, 128, %s478_s5, [#allocation3]  }
 0x127   :  { %341 = dma.done.wait [#allocation3], 128  }
 0x128   :  { %342 = vsyncadd [#allocation3], 4294967168 }
 0x129   :  { %207 = vsyncpa [#allocation3], 1 }

</bundles_post_ra>
